<compile_context>
chip_gen: v7x
topology: tpu7x:2x2x1
jax: 0.10.0
libtpu: 0.0.40
codegen_flags: <defaults>
</compile_context>

<pallas_src>
import functools

import jax
import jax.numpy as jnp
from jax.experimental import pallas as pl
from jax.experimental.pallas import tpu as pltpu

PAD_ID = 0
RM_ORTHO_REG = 0.1


def _gather_project_kernel(flat_idx_ref, h_ref, w_ref, out_ref,
                           feats_ref, sem_ref, *, tb, batch):
    """Gather the last-token hidden rows for `tb` sequences and project them
    onto the stacked, pre-transposed [D, 2H] weights with one MXU matmul."""
    b = pl.program_id(0)
    base = b * tb

    # Read every row index from SMEM and build every copy descriptor BEFORE
    # the first .wait() (keeps scalar loads away from DMA waits), then launch
    # all DMAs so they are in flight concurrently and the HBM latency is paid
    # once per grid step.  Padded grid rows clamp to batch-1 (duplicate rows,
    # sliced off in the wrapper) so every DMA stays in bounds.
    copies = []
    for r in range(tb):
        gb = jnp.minimum(base + r, batch - 1)
        src_row = flat_idx_ref[gb]              # flat (b * S + last_token) row
        copies.append(pltpu.make_async_copy(
            h_ref.at[pl.ds(src_row, 1), :],     # [1, D] row in HBM
            feats_ref.at[pl.ds(r, 1), :],       # [1, D] row in VMEM scratch
            sem_ref,                            # single shared DMA semaphore
        ))
    for cp in copies:
        cp.start()
    for cp in copies:
        cp.wait()                               # each wait = one row's bytes

    feats = feats_ref[...]                      # [tb, D], hidden dtype
    # Fused projection: [tb, D] @ [D, 2H] -> [tb, 2H] = (rewards | v_head),
    # f32 accumulation on the MXU.
    out_ref[...] = jnp.dot(
        feats, w_ref[...], preferred_element_type=jnp.float32
    ).astype(out_ref.dtype)


def _round_up(x, m):
    return ((x + m - 1) // m) * m


def two_head_reward_forward(input_ids, hidden_states, v_head_weight,
                            pad_id=PAD_ID, rm_ortho_reg=RM_ORTHO_REG):
    B, S = input_ids.shape
    D = hidden_states.shape[-1]
    H = v_head_weight.shape[0]
    bs = B // 2

    # ---------------- plain-JAX prologue (cheap, O(B*S) / O(H*D)) -----------
    seqlens = jnp.sum((input_ids != pad_id).astype(jnp.int32), axis=-1)       # [B]
    # PyTorch hidden_states[arange(B), seqlens - 1] wraps to the last position
    # when a row is all-pad (seqlens == 0); reproduce that here.
    last_idx = jnp.where(seqlens > 0, seqlens - 1, S - 1).astype(jnp.int32)   # [B]
    flat_idx = (jnp.arange(B, dtype=jnp.int32) * S + last_idx).astype(jnp.int32)

    w = v_head_weight.astype(jnp.float32)                                     # [H, D]
    wc = w - jnp.mean(w, axis=-1, keepdims=True)
    norms = jnp.maximum(jnp.linalg.norm(wc, axis=-1, keepdims=True), 1e-8)
    wn = wc / norms                                                           # [H, D]
    # Pre-transpose to [D, 2H] in the wrapper (one-time, tiny) so the kernel
    # does a plain NN matmul with no in-kernel relayout of the resident weight.
    # Note: cast to hidden_states.dtype (e.g. bf16) before the matmul; the
    # accumulate is still f32 but the normalization loses a little precision
    # vs. a pure-f32 reference (documented tolerance below).
    w_stacked_t = jnp.concatenate([wn, w], axis=0).T.astype(hidden_states.dtype)  # [D, 2H]

    # ---------------- Pallas: gather + fused projection ---------------------
    # Whole (half-)batch per grid step (capped at 128 rows, multiple of 8).
    # At least 2 "parallel" grid steps so v7x's 2 TensorCores both get work.
    tb = min(128, _round_up(max(int(pl.cdiv(B, 2)), 1), 8))
    nb = max(2, int(pl.cdiv(B, tb)))
    b_pad = nb * tb

    kernel = functools.partial(_gather_project_kernel, tb=tb, batch=B)

    grid_spec = pltpu.PrefetchScalarGridSpec(
        num_scalar_prefetch=1,                       # flat_idx -> SMEM
        grid=(nb,),
        in_specs=[
            pl.BlockSpec(memory_space=pl.ANY),       # hidden_states stays in HBM
            pl.BlockSpec((D, 2 * H), lambda b, idx: (0, 0)),   # resident weight
        ],
        out_specs=pl.BlockSpec((tb, 2 * H), lambda b, idx: (b, 0)),
        scratch_shapes=[
            pltpu.VMEM((tb, D), hidden_states.dtype),          # gathered feats
            pltpu.SemaphoreType.DMA,                           # one shared DMA sem
        ],
    )

    # VMEM budget: feats scratch + double-buffered weight/output blocks, with
    # 2x headroom, clamped to <= 48 MiB so it is safe on v7x (64 MiB VMEM);
    # v5e/v6e have 128 MiB so this never binds there.
    itemsize = jnp.dtype(hidden_states.dtype).itemsize
    vmem_needed = (tb * D * itemsize
                   + 2 * D * 2 * H * itemsize
                   + 2 * tb * 2 * H * 4)
    vmem_limit = int(min(48 * 1024 * 1024,
                         max(32 * 1024 * 1024, 2 * vmem_needed)))

    proj = pl.pallas_call(
        kernel,
        out_shape=jax.ShapeDtypeStruct((b_pad, 2 * H), jnp.float32),
        grid_spec=grid_spec,
        compiler_params=pltpu.CompilerParams(
            dimension_semantics=("parallel",),       # shard batch across TCs (v7x)
            vmem_limit_bytes=vmem_limit,
        ),
    )(flat_idx, hidden_states.reshape(B * S, D), w_stacked_t)

    proj = proj[:B].astype(jnp.float32)              # drop batch padding
    rewards = proj[:, :H]                            # normalized-weight proj
    vhead = proj[:, H:]                              # raw v_head(feats)

    # ---------------- plain-JAX epilogue (scalar loss math) -----------------
    chosen = jnp.sum(rewards[:bs], axis=-1)          # [bs]
    rejected = jnp.sum(rewards[bs:], axis=-1)        # [bs]
    loss = -jnp.mean(jax.nn.log_sigmoid(chosen - rejected))

    if H > 1:
        prod = wn @ wn.T                             # [H, H]
        mean_corr = jnp.sum(jnp.abs(jnp.triu(prod, k=1))) / (H * (H - 1) / 2.0)
    else:
        mean_corr = jnp.float32(0.0)
    total_loss = loss + rm_ortho_reg * mean_corr

    return {
        "seqlens": seqlens,
        "v_head": vhead,
        "length_reward": rewards[:, -1],
        "chosen_quality_reward": rewards[:bs, 0],
        "rejected_quality_reward": rewards[bs:, 0],
        "loss": total_loss,
        "rewards": rewards,
        "ortho_loss": mean_corr,
        "regression_loss": jnp.float32(0.0),
        "chosen_mean_scores": chosen,
        "rejected_mean_scores": rejected,
        "chosen_rewards": chosen,
    }


if __name__ == "__main__":
    # Small shapes consistent with the module's forward:
    #   B = 2*bs paired (chosen, rejected) sequences, S tokens, D hidden, H heads.
    bs, S, D, H, vocab = 2, 8, 32, 2, 16
    B = 2 * bs

    key = jax.random.PRNGKey(0)
    k_ids, k_emb, k_w = jax.random.split(key, 3)

    # Token ids in [1, vocab); zero out a trailing region as PAD (PAD_ID = 0)
    # so that seqlens vary per row.
    input_ids = jax.random.randint(k_ids, (B, S), 1, vocab, dtype=jnp.int32)
    pad_lens = jnp.array([0, 2, 1, 3], dtype=jnp.int32)
    pos = jnp.arange(S)[None, :]
    input_ids = jnp.where(pos < (S - pad_lens)[:, None], input_ids, PAD_ID)
    input_ids = input_ids.astype(jnp.int32)

    # Stand-in for the base transformer output (deterministic embedding lookup).
    emb_table = jax.random.normal(k_emb, (vocab, D), dtype=jnp.float32)
    hidden_states = emb_table[input_ids]                          # [B, S, D]

    # v_head: nn.Linear(D, H, bias=False).weight  -> shape [H, D]
    v_head_weight = 0.02 * jax.random.normal(k_w, (H, D), dtype=jnp.float32)

    out = two_head_reward_forward(input_ids, hidden_states, v_head_weight)
    out = jax.block_until_ready(out)

    # Silent sanity check against a plain-JAX reference of the same math.
    seqlens_ref = jnp.sum((input_ids != PAD_ID).astype(jnp.int32), axis=-1)
    last_ref = jnp.where(seqlens_ref > 0, seqlens_ref - 1, S - 1)
    feats_ref = hidden_states[jnp.arange(B), last_ref]
    wc_ref = v_head_weight - jnp.mean(v_head_weight, axis=-1, keepdims=True)
    wn_ref = wc_ref / jnp.maximum(
        jnp.linalg.norm(wc_ref, axis=-1, keepdims=True), 1e-8)
    rewards_ref = feats_ref @ wn_ref.T
    vhead_ref = feats_ref @ v_head_weight.T
    assert jnp.allclose(out["rewards"], rewards_ref, rtol=1e-2, atol=1e-2)
    assert jnp.allclose(out["v_head"], vhead_ref, rtol=1e-2, atol=1e-2)

    print("KERNEL_OK")
</pallas_src>

<mosaic_0001>
module attributes {stable_mosaic.version = 11 : i64} {
  func.func @_gather_project_kernel(%arg0: i32, %arg1: memref<4xi32, #tpu.memory_space<smem>>, %arg2: memref<32x32xf32, #tpu.memory_space<any>>, %arg3: memref<32x4xf32, #tpu.memory_space<vmem>>, %arg4: memref<8x4xf32, #tpu.memory_space<vmem>>, %arg5: memref<8x32xf32, #tpu.memory_space<vmem>>, %arg6: memref<!tpu.dma_semaphore, #tpu.memory_space<semaphore_mem>>) attributes {dimension_semantics = [#tpu.dimension_semantics<parallel>], iteration_bounds = array<i64: 2>, scalar_prefetch = 1 : i64, scratch_operands = 2 : i64, tpu.core_type = #tpu.core_type<tc>, window_params = [{}, {pipeline_mode = #tpu.pipeline_mode<synchronous>, transform_indices = @transform_1, window_bounds = array<i64: 32, 4>}, {transform_indices = @transform_2, window_bounds = array<i64: 8, 4>}]} {
    %c8_i32 = arith.constant 8 : i32
    %0 = arith.muli %arg0, %c8_i32 : i32
    %c0_i32 = arith.constant 0 : i32
    %1 = arith.addi %0, %c0_i32 : i32
    %c3_i32 = arith.constant 3 : i32
    %2 = arith.minsi %1, %c3_i32 : i32
    %3 = arith.index_cast %2 : i32 to index
    %4 = memref.load %arg1[%3] : memref<4xi32, #tpu.memory_space<smem>>
    %c1_i32 = arith.constant 1 : i32
    %5 = arith.addi %0, %c1_i32 : i32
    %c3_i32_0 = arith.constant 3 : i32
    %6 = arith.minsi %5, %c3_i32_0 : i32
    %7 = arith.index_cast %6 : i32 to index
    %8 = memref.load %arg1[%7] : memref<4xi32, #tpu.memory_space<smem>>
    %c2_i32 = arith.constant 2 : i32
    %9 = arith.addi %0, %c2_i32 : i32
    %c3_i32_1 = arith.constant 3 : i32
    %10 = arith.minsi %9, %c3_i32_1 : i32
    %11 = arith.index_cast %10 : i32 to index
    %12 = memref.load %arg1[%11] : memref<4xi32, #tpu.memory_space<smem>>
    %c3_i32_2 = arith.constant 3 : i32
    %13 = arith.addi %0, %c3_i32_2 : i32
    %c3_i32_3 = arith.constant 3 : i32
    %14 = arith.minsi %13, %c3_i32_3 : i32
    %15 = arith.index_cast %14 : i32 to index
    %16 = memref.load %arg1[%15] : memref<4xi32, #tpu.memory_space<smem>>
    %c4_i32 = arith.constant 4 : i32
    %17 = arith.addi %0, %c4_i32 : i32
    %c3_i32_4 = arith.constant 3 : i32
    %18 = arith.minsi %17, %c3_i32_4 : i32
    %19 = arith.index_cast %18 : i32 to index
    %20 = memref.load %arg1[%19] : memref<4xi32, #tpu.memory_space<smem>>
    %c5_i32 = arith.constant 5 : i32
    %21 = arith.addi %0, %c5_i32 : i32
    %c3_i32_5 = arith.constant 3 : i32
    %22 = arith.minsi %21, %c3_i32_5 : i32
    %23 = arith.index_cast %22 : i32 to index
    %24 = memref.load %arg1[%23] : memref<4xi32, #tpu.memory_space<smem>>
    %c6_i32 = arith.constant 6 : i32
    %25 = arith.addi %0, %c6_i32 : i32
    %c3_i32_6 = arith.constant 3 : i32
    %26 = arith.minsi %25, %c3_i32_6 : i32
    %27 = arith.index_cast %26 : i32 to index
    %28 = memref.load %arg1[%27] : memref<4xi32, #tpu.memory_space<smem>>
    %c7_i32 = arith.constant 7 : i32
    %29 = arith.addi %0, %c7_i32 : i32
    %c3_i32_7 = arith.constant 3 : i32
    %30 = arith.minsi %29, %c3_i32_7 : i32
    %31 = arith.index_cast %30 : i32 to index
    %32 = memref.load %arg1[%31] : memref<4xi32, #tpu.memory_space<smem>>
    %c0_i32_8 = arith.constant 0 : i32
    %33 = tpu.memref_slice %arg2[%4, %c0_i32_8] : memref<32x32xf32, #tpu.memory_space<any>> -> memref<1x32xf32, #tpu.memory_space<any>>
    %c0_i32_9 = arith.constant 0 : i32
    %c0_i32_10 = arith.constant 0 : i32
    %34 = tpu.memref_slice %arg5[%c0_i32_9, %c0_i32_10] : memref<8x32xf32, #tpu.memory_space<vmem>> -> memref<1x32xf32, #tpu.memory_space<vmem>>
    tpu.enqueue_dma source(%33 : memref<1x32xf32, #tpu.memory_space<any>>) target(%34 : memref<1x32xf32, #tpu.memory_space<vmem>>) target_semaphore(%arg6 : memref<!tpu.dma_semaphore, #tpu.memory_space<semaphore_mem>>)
    %c0_i32_11 = arith.constant 0 : i32
    %35 = tpu.memref_slice %arg2[%8, %c0_i32_11] : memref<32x32xf32, #tpu.memory_space<any>> -> memref<1x32xf32, #tpu.memory_space<any>>
    %c1_i32_12 = arith.constant 1 : i32
    %c0_i32_13 = arith.constant 0 : i32
    %36 = tpu.memref_slice %arg5[%c1_i32_12, %c0_i32_13] : memref<8x32xf32, #tpu.memory_space<vmem>> -> memref<1x32xf32, #tpu.memory_space<vmem>>
    tpu.enqueue_dma source(%35 : memref<1x32xf32, #tpu.memory_space<any>>) target(%36 : memref<1x32xf32, #tpu.memory_space<vmem>>) target_semaphore(%arg6 : memref<!tpu.dma_semaphore, #tpu.memory_space<semaphore_mem>>)
    %c0_i32_14 = arith.constant 0 : i32
    %37 = tpu.memref_slice %arg2[%12, %c0_i32_14] : memref<32x32xf32, #tpu.memory_space<any>> -> memref<1x32xf32, #tpu.memory_space<any>>
    %c2_i32_15 = arith.constant 2 : i32
    %c0_i32_16 = arith.constant 0 : i32
    %38 = tpu.memref_slice %arg5[%c2_i32_15, %c0_i32_16] : memref<8x32xf32, #tpu.memory_space<vmem>> -> memref<1x32xf32, #tpu.memory_space<vmem>>
    tpu.enqueue_dma source(%37 : memref<1x32xf32, #tpu.memory_space<any>>) target(%38 : memref<1x32xf32, #tpu.memory_space<vmem>>) target_semaphore(%arg6 : memref<!tpu.dma_semaphore, #tpu.memory_space<semaphore_mem>>)
    %c0_i32_17 = arith.constant 0 : i32
    %39 = tpu.memref_slice %arg2[%16, %c0_i32_17] : memref<32x32xf32, #tpu.memory_space<any>> -> memref<1x32xf32, #tpu.memory_space<any>>
    %c3_i32_18 = arith.constant 3 : i32
    %c0_i32_19 = arith.constant 0 : i32
    %40 = tpu.memref_slice %arg5[%c3_i32_18, %c0_i32_19] : memref<8x32xf32, #tpu.memory_space<vmem>> -> memref<1x32xf32, #tpu.memory_space<vmem>>
    tpu.enqueue_dma source(%39 : memref<1x32xf32, #tpu.memory_space<any>>) target(%40 : memref<1x32xf32, #tpu.memory_space<vmem>>) target_semaphore(%arg6 : memref<!tpu.dma_semaphore, #tpu.memory_space<semaphore_mem>>)
    %c0_i32_20 = arith.constant 0 : i32
    %41 = tpu.memref_slice %arg2[%20, %c0_i32_20] : memref<32x32xf32, #tpu.memory_space<any>> -> memref<1x32xf32, #tpu.memory_space<any>>
    %c4_i32_21 = arith.constant 4 : i32
    %c0_i32_22 = arith.constant 0 : i32
    %42 = tpu.memref_slice %arg5[%c4_i32_21, %c0_i32_22] : memref<8x32xf32, #tpu.memory_space<vmem>> -> memref<1x32xf32, #tpu.memory_space<vmem>>
    tpu.enqueue_dma source(%41 : memref<1x32xf32, #tpu.memory_space<any>>) target(%42 : memref<1x32xf32, #tpu.memory_space<vmem>>) target_semaphore(%arg6 : memref<!tpu.dma_semaphore, #tpu.memory_space<semaphore_mem>>)
    %c0_i32_23 = arith.constant 0 : i32
    %43 = tpu.memref_slice %arg2[%24, %c0_i32_23] : memref<32x32xf32, #tpu.memory_space<any>> -> memref<1x32xf32, #tpu.memory_space<any>>
    %c5_i32_24 = arith.constant 5 : i32
    %c0_i32_25 = arith.constant 0 : i32
    %44 = tpu.memref_slice %arg5[%c5_i32_24, %c0_i32_25] : memref<8x32xf32, #tpu.memory_space<vmem>> -> memref<1x32xf32, #tpu.memory_space<vmem>>
    tpu.enqueue_dma source(%43 : memref<1x32xf32, #tpu.memory_space<any>>) target(%44 : memref<1x32xf32, #tpu.memory_space<vmem>>) target_semaphore(%arg6 : memref<!tpu.dma_semaphore, #tpu.memory_space<semaphore_mem>>)
    %c0_i32_26 = arith.constant 0 : i32
    %45 = tpu.memref_slice %arg2[%28, %c0_i32_26] : memref<32x32xf32, #tpu.memory_space<any>> -> memref<1x32xf32, #tpu.memory_space<any>>
    %c6_i32_27 = arith.constant 6 : i32
    %c0_i32_28 = arith.constant 0 : i32
    %46 = tpu.memref_slice %arg5[%c6_i32_27, %c0_i32_28] : memref<8x32xf32, #tpu.memory_space<vmem>> -> memref<1x32xf32, #tpu.memory_space<vmem>>
    tpu.enqueue_dma source(%45 : memref<1x32xf32, #tpu.memory_space<any>>) target(%46 : memref<1x32xf32, #tpu.memory_space<vmem>>) target_semaphore(%arg6 : memref<!tpu.dma_semaphore, #tpu.memory_space<semaphore_mem>>)
    %c0_i32_29 = arith.constant 0 : i32
    %47 = tpu.memref_slice %arg2[%32, %c0_i32_29] : memref<32x32xf32, #tpu.memory_space<any>> -> memref<1x32xf32, #tpu.memory_space<any>>
    %c7_i32_30 = arith.constant 7 : i32
    %c0_i32_31 = arith.constant 0 : i32
    %48 = tpu.memref_slice %arg5[%c7_i32_30, %c0_i32_31] : memref<8x32xf32, #tpu.memory_space<vmem>> -> memref<1x32xf32, #tpu.memory_space<vmem>>
    tpu.enqueue_dma source(%47 : memref<1x32xf32, #tpu.memory_space<any>>) target(%48 : memref<1x32xf32, #tpu.memory_space<vmem>>) target_semaphore(%arg6 : memref<!tpu.dma_semaphore, #tpu.memory_space<semaphore_mem>>)
    %c0_i32_32 = arith.constant 0 : i32
    %49 = tpu.memref_slice %arg2[%4, %c0_i32_32] : memref<32x32xf32, #tpu.memory_space<any>> -> memref<1x32xf32, #tpu.memory_space<any>>
    %c0_i32_33 = arith.constant 0 : i32
    %c0_i32_34 = arith.constant 0 : i32
    %50 = tpu.memref_slice %arg5[%c0_i32_33, %c0_i32_34] : memref<8x32xf32, #tpu.memory_space<vmem>> -> memref<1x32xf32, #tpu.memory_space<vmem>>
    tpu.wait_dma2 semaphore(%arg6 : memref<!tpu.dma_semaphore, #tpu.memory_space<semaphore_mem>>) src(%49 : memref<1x32xf32, #tpu.memory_space<any>>) dst(%50 : memref<1x32xf32, #tpu.memory_space<vmem>>)
    %c0_i32_35 = arith.constant 0 : i32
    %51 = tpu.memref_slice %arg2[%8, %c0_i32_35] : memref<32x32xf32, #tpu.memory_space<any>> -> memref<1x32xf32, #tpu.memory_space<any>>
    %c1_i32_36 = arith.constant 1 : i32
    %c0_i32_37 = arith.constant 0 : i32
    %52 = tpu.memref_slice %arg5[%c1_i32_36, %c0_i32_37] : memref<8x32xf32, #tpu.memory_space<vmem>> -> memref<1x32xf32, #tpu.memory_space<vmem>>
    tpu.wait_dma2 semaphore(%arg6 : memref<!tpu.dma_semaphore, #tpu.memory_space<semaphore_mem>>) src(%51 : memref<1x32xf32, #tpu.memory_space<any>>) dst(%52 : memref<1x32xf32, #tpu.memory_space<vmem>>)
    %c0_i32_38 = arith.constant 0 : i32
    %53 = tpu.memref_slice %arg2[%12, %c0_i32_38] : memref<32x32xf32, #tpu.memory_space<any>> -> memref<1x32xf32, #tpu.memory_space<any>>
    %c2_i32_39 = arith.constant 2 : i32
    %c0_i32_40 = arith.constant 0 : i32
    %54 = tpu.memref_slice %arg5[%c2_i32_39, %c0_i32_40] : memref<8x32xf32, #tpu.memory_space<vmem>> -> memref<1x32xf32, #tpu.memory_space<vmem>>
    tpu.wait_dma2 semaphore(%arg6 : memref<!tpu.dma_semaphore, #tpu.memory_space<semaphore_mem>>) src(%53 : memref<1x32xf32, #tpu.memory_space<any>>) dst(%54 : memref<1x32xf32, #tpu.memory_space<vmem>>)
    %c0_i32_41 = arith.constant 0 : i32
    %55 = tpu.memref_slice %arg2[%16, %c0_i32_41] : memref<32x32xf32, #tpu.memory_space<any>> -> memref<1x32xf32, #tpu.memory_space<any>>
    %c3_i32_42 = arith.constant 3 : i32
    %c0_i32_43 = arith.constant 0 : i32
    %56 = tpu.memref_slice %arg5[%c3_i32_42, %c0_i32_43] : memref<8x32xf32, #tpu.memory_space<vmem>> -> memref<1x32xf32, #tpu.memory_space<vmem>>
    tpu.wait_dma2 semaphore(%arg6 : memref<!tpu.dma_semaphore, #tpu.memory_space<semaphore_mem>>) src(%55 : memref<1x32xf32, #tpu.memory_space<any>>) dst(%56 : memref<1x32xf32, #tpu.memory_space<vmem>>)
    %c0_i32_44 = arith.constant 0 : i32
    %57 = tpu.memref_slice %arg2[%20, %c0_i32_44] : memref<32x32xf32, #tpu.memory_space<any>> -> memref<1x32xf32, #tpu.memory_space<any>>
    %c4_i32_45 = arith.constant 4 : i32
    %c0_i32_46 = arith.constant 0 : i32
    %58 = tpu.memref_slice %arg5[%c4_i32_45, %c0_i32_46] : memref<8x32xf32, #tpu.memory_space<vmem>> -> memref<1x32xf32, #tpu.memory_space<vmem>>
    tpu.wait_dma2 semaphore(%arg6 : memref<!tpu.dma_semaphore, #tpu.memory_space<semaphore_mem>>) src(%57 : memref<1x32xf32, #tpu.memory_space<any>>) dst(%58 : memref<1x32xf32, #tpu.memory_space<vmem>>)
    %c0_i32_47 = arith.constant 0 : i32
    %59 = tpu.memref_slice %arg2[%24, %c0_i32_47] : memref<32x32xf32, #tpu.memory_space<any>> -> memref<1x32xf32, #tpu.memory_space<any>>
    %c5_i32_48 = arith.constant 5 : i32
    %c0_i32_49 = arith.constant 0 : i32
    %60 = tpu.memref_slice %arg5[%c5_i32_48, %c0_i32_49] : memref<8x32xf32, #tpu.memory_space<vmem>> -> memref<1x32xf32, #tpu.memory_space<vmem>>
    tpu.wait_dma2 semaphore(%arg6 : memref<!tpu.dma_semaphore, #tpu.memory_space<semaphore_mem>>) src(%59 : memref<1x32xf32, #tpu.memory_space<any>>) dst(%60 : memref<1x32xf32, #tpu.memory_space<vmem>>)
    %c0_i32_50 = arith.constant 0 : i32
    %61 = tpu.memref_slice %arg2[%28, %c0_i32_50] : memref<32x32xf32, #tpu.memory_space<any>> -> memref<1x32xf32, #tpu.memory_space<any>>
    %c6_i32_51 = arith.constant 6 : i32
    %c0_i32_52 = arith.constant 0 : i32
    %62 = tpu.memref_slice %arg5[%c6_i32_51, %c0_i32_52] : memref<8x32xf32, #tpu.memory_space<vmem>> -> memref<1x32xf32, #tpu.memory_space<vmem>>
    tpu.wait_dma2 semaphore(%arg6 : memref<!tpu.dma_semaphore, #tpu.memory_space<semaphore_mem>>) src(%61 : memref<1x32xf32, #tpu.memory_space<any>>) dst(%62 : memref<1x32xf32, #tpu.memory_space<vmem>>)
    %c0_i32_53 = arith.constant 0 : i32
    %63 = tpu.memref_slice %arg2[%32, %c0_i32_53] : memref<32x32xf32, #tpu.memory_space<any>> -> memref<1x32xf32, #tpu.memory_space<any>>
    %c7_i32_54 = arith.constant 7 : i32
    %c0_i32_55 = arith.constant 0 : i32
    %64 = tpu.memref_slice %arg5[%c7_i32_54, %c0_i32_55] : memref<8x32xf32, #tpu.memory_space<vmem>> -> memref<1x32xf32, #tpu.memory_space<vmem>>
    tpu.wait_dma2 semaphore(%arg6 : memref<!tpu.dma_semaphore, #tpu.memory_space<semaphore_mem>>) src(%63 : memref<1x32xf32, #tpu.memory_space<any>>) dst(%64 : memref<1x32xf32, #tpu.memory_space<vmem>>)
    %c0 = arith.constant 0 : index
    %c0_56 = arith.constant 0 : index
    %65 = vector.load %arg5[%c0, %c0_56] : memref<8x32xf32, #tpu.memory_space<vmem>>, vector<8x32xf32>
    %c0_57 = arith.constant 0 : index
    %c0_58 = arith.constant 0 : index
    %66 = vector.load %arg3[%c0_57, %c0_58] : memref<32x4xf32, #tpu.memory_space<vmem>>, vector<32x4xf32>
    %cst = arith.constant dense<0.000000e+00> : vector<8x4xf32>
    %67 = tpu.matmul %65, %66, %cst {dimension_numbers = #tpu.dot_dimension_numbers<[1], [0], [0], [1], [0, 0, 1, 1], [], []>} : vector<8x32xf32>, vector<32x4xf32>, vector<8x4xf32> -> vector<8x4xf32>
    %c0_59 = arith.constant 0 : index
    %c0_60 = arith.constant 0 : index
    %68 = vector.load %arg4[%c0_59, %c0_60] : memref<8x4xf32, #tpu.memory_space<vmem>>, vector<8x4xf32>
    tpu.vector_store %arg4[%c0_59, %c0_60], %67 {strides = array<i32>} : memref<8x4xf32, #tpu.memory_space<vmem>>, vector<8x4xf32>,
    return
  }
  func.func @transform_1(%arg0: i32, %arg1: memref<4xi32, #tpu.memory_space<smem>>) -> (i32, i32) {
    %c0_i32 = arith.constant 0 : i32
    %c0_i32_0 = arith.constant 0 : i32
    %c0_i32_1 = arith.constant 0 : i32
    return %c0_i32, %c0_i32_0 : i32, i32
  }
  func.func @transform_2(%arg0: i32, %arg1: memref<4xi32, #tpu.memory_space<smem>>) -> (i32, i32) {
    %c0_i32 = arith.constant 0 : i32
    %c0_i32_0 = arith.constant 0 : i32
    return %arg0, %c0_i32 : i32, i32
  }
}

</mosaic_0001>

<bundles_post_ra>
// kernel: tpu_custom_call.1
= control target key start
LH: loop header
LB: loop body
LE: loop exit
PB: predicated region body
PF: predicated region fallthrough
CT: control target
= control target key end

     0   :  { %s904_s0 = inlined_call_operand.vmem [shape: s32[4], index: 0, kind: input, shape index: {}]   ;;  %s905_s1 = inlined_call_operand.vmem [shape: f32[32,32], index: 1, kind: input, shape index: {}]   ;;  %s906_s2 = inlined_call_operand.vmem [shape: f32[32,4], index: 2, kind: input, shape index: {}]   ;;  %s907_s3 = inlined_call_operand.vmem [shape: f32[16,4], index: 3, kind: output, shape index: {}]  }
   0x1   :  { %s8_s14 = sshll.u32 %s904_s0, 4  ;;  %s9_s14 = int_to_ptr.vmem [resolvable:$true] %s8_s14 }
   0x2   :  { %s786_s15 = scalar_lea.vmem %s9_s14, 16  ;;  %p791_p1 = scmp.lt.s32.totalorder %s9_s14, %s9_s14 }
   0x3   :  { %p787_p0 = scmp.ne.s32.totalorder %s9_s14, %s786_s15  ;;  %p792_p2 = scmp.lt.s32.totalorder %s786_s15, %s786_s15 }
   0x5   :  { %p793_p3 = por %p792_p2, %p791_p1 }
   0x7   :  { %p794_p4 = pnand %p793_p3, %p787_p0 }
   0x9   :  { %797 = shalt.err (!%p794_p4)  }
   0xa   :  { %s810_s16 = smov [#allocation5]  }
   0xb   :  { %11 = dma.vmem_to_smem %s9_s14, 16, %s810_s16, [#allocation4] }
   0xc   :  { %802 = dma.done.wait [#allocation4], 16 }
   0xd   :  { %803 = vsyncadd [#allocation4], 4294967280 }
   0xe   :  { %13 = sfence }
   0xf   :  { %s837_s17 = smov 0  }
  0x10 LB: > { %s742_s0 = sadd.s32 4294967295, %s808_s17   ;;  %p745_p5 = scmp.ge.s32.totalorder %s808_s17, 1  ;;  %s808_s17 = sphi %s837_s17, %s19_s17  }
  0x11   : > { %p85_p6 = scmp.lt.s32.totalorder %s808_s17, 3 }
  0x13   : > { %p86_p7 = pnand %p745_p5, %p85_p6 }
  0x14   : > { %p99_p8 = scmp.lt.s32.totalorder (!%p86_p7), %s742_s0, 1  ;;  %s845_s18 = sshll.u32 (!%p86_p7), %s742_s0, 3 }
  0x15   : > { %89 = sbr.rel (%p86_p7) target bundleno = 288 (0x120), region = 24  ;;  %p104_p9 = scmp.lt.s32.totalorder (!%p86_p7), %s845_s18, 3 }
  0x16   : > { %s107_s19 = sadd.s32 (!%p86_p7), 1, %s845_s18  ;;  %s111_s26 = sadd.s32 (!%p86_p7), 2, %s845_s18 }
  0x17   : > { %p108_p10 = scmp.lt.s32.totalorder (!%p86_p7), %s107_s19, 3  ;;  %s115_s27 = sadd.s32 (!%p86_p7), 3, %s845_s18 }
  0x18   : > { %p112_p11 = scmp.lt.s32.totalorder (!%p86_p7), %s111_s26, 3  ;;  %p116_p12 = scmp.lt.s32.totalorder (!%p86_p7), %s115_s27, 3 }
  0x19   : > { %s119_s29 = sadd.s32 (!%p86_p7), 4, %s845_s18  ;;  %s123_s5 = sadd.s32 (!%p86_p7), 5, %s845_s18 }
  0x1a   : > { %p120_p13 = scmp.lt.s32.totalorder (!%p86_p7), %s119_s29, 3  ;;  %p124_p0 = scmp.lt.s32.totalorder (!%p86_p7), %s123_s5, 3 }
  0x1b   : > { %s127_s6 = sadd.s32 (!%p86_p7), 6, %s845_s18  ;;  %s131_s9 = sadd.s32 (!%p86_p7), 7, %s845_s18 }
  0x1c   : > { %s909_s0 = smov (!%p99_p8, %s742_s0), 1  ;;  %s911_s19 = smov (!%p108_p10, %s107_s19), 3 }
  0x1d   : > { %s105_s20 = scalar_select %p104_p9, %s845_s18, 3 }
  0x1e   : > { %s746_s21 = sshll.u32 %s909_s0, 3  ;;  %s110_s28 = sld [smem:[#allocation5 + %s911_s19]] }
  0x1f   : > { %s853_s24 = scalar_lea.vmem %s907_s3, %s746_s21  ;;  %s106_s25 = sld [smem:[#allocation5 + %s105_s20]] }
  0x20   : > { %s913_s26 = smov (!%p112_p11, %s111_s26), 3  ;;  %s915_s27 = smov (!%p116_p12, %s115_s27), 3 }
  0x21   : > { %s114_s30 = sld [smem:[#allocation5 + %s913_s26]]  ;;  %s917_s29 = smov (!%p120_p13, %s119_s29), 3 }
  0x22   : > { %s118_s4 = sld [smem:[#allocation5 + %s915_s27]]  ;;  %p128_p1 = scmp.lt.s32.totalorder %s127_s6, 3 }
  0x23   : > { %s122_s7 = sld [smem:[#allocation5 + %s917_s29]]  ;;  %s919_s5 = smov (!%p124_p0, %s123_s5), 3 }
  0x24   : > { %s921_s6 = smov (!%p128_p1, %s127_s6), 3  ;;  %s126_s8 = sld [smem:[#allocation5 + %s919_s5]] }
  0x25   : > { %s861_s10 = sld [smem:[#allocation5 + %s921_s6]]  ;;  %p132_p2 = scmp.lt.s32.totalorder %s131_s9, 3 }
  0x26   : > { %s135_s13 = scalar_lea.vmem %s905_s1, %s106_s25 }
  0x27   : > { %s923_s9 = smov (!%p132_p2, %s131_s9), 3  ;;  %v153_v0 = vld [vmem:[%s135_s13] sm:$0x1] }
  0x28   : > { %154 = vst [vmem:[#allocation2] sm:$0x1] %v153_v0  ;;  %s134_s14 = sld [smem:[#allocation5 + %s923_s9]] }
  0x29   : > { %179 = vsyncadd [#allocation3], 16  ;;  %s180_s0 = scalar_lea.vmem %s905_s1, %s110_s28 }
  0x2a   : > { %v199_v1 = vld [vmem:[%s180_s0] sm:$0x1] }
  0x2b   : > { %200 = vst [vmem:[#allocation2 + $0x1] sm:$0x1] %v199_v1 }
  0x2c   : > { %225 = vsyncadd [#allocation3], 16  ;;  %s226_s20 = scalar_lea.vmem %s905_s1, %s114_s30 }
  0x2d   : > { %v245_v2 = vld [vmem:[%s226_s20] sm:$0x1] }
  0x2e   : > { %246 = vst [vmem:[#allocation2 + $0x2] sm:$0x1] %v245_v2 }
  0x2f   : > { %271 = vsyncadd [#allocation3], 16  ;;  %s272_s23 = scalar_lea.vmem %s905_s1, %s118_s4 }
  0x30   : > { %v291_v3 = vld [vmem:[%s272_s23] sm:$0x1] }
  0x31   : > { %292 = vst [vmem:[#allocation2 + $0x3] sm:$0x1] %v291_v3 }
  0x32   : > { %317 = vsyncadd [#allocation3], 16  ;;  %s318_s27 = scalar_lea.vmem %s905_s1, %s122_s7 }
  0x33   : > { %v337_v4 = vld [vmem:[%s318_s27] sm:$0x1] }
  0x34   : > { %338 = vst [vmem:[#allocation2 + $0x4] sm:$0x1] %v337_v4 }
  0x35   : > { %363 = vsyncadd [#allocation3], 16  ;;  %s364_s30 = scalar_lea.vmem %s905_s1, %s126_s8 }
  0x36   : > { %v383_v5 = vld [vmem:[%s364_s30] sm:$0x1] }
  0x37   : > { %384 = vst [vmem:[#allocation2 + $0x5] sm:$0x1] %v383_v5 }
  0x38   : > { %409 = vsyncadd [#allocation3], 16  ;;  %s410_s6 = scalar_lea.vmem %s905_s1, %s861_s10 }
  0x39   : > { %v429_v6 = vld [vmem:[%s410_s6] sm:$0x1] }
  0x3a   : > { %430 = vst [vmem:[#allocation2 + $0x6] sm:$0x1] %v429_v6 }
  0x3b   : > { %455 = vsyncadd [#allocation3], 16  ;;  %s456_s11 = scalar_lea.vmem %s905_s1, %s134_s14 }
  0x3c   : > { %v475_v7 = vld [vmem:[%s456_s11] sm:$0x1] }
  0x3d   : > { %476 = vst [vmem:[#allocation2 + $0x7] sm:$0x1] %v475_v7 }
  0x3e   : > { %501 = vsyncadd [#allocation3], 16 }
  0x3f   : > { %804 = dma.done.wait [#allocation3], 128 }
  0x40   : > { %805 = vsyncadd [#allocation3], 4294967168  ;;  %v811_v8 = vmov 0.0|0.0   ;;  %vm812_vm0 = vmmov 0   ;;  %v813_v9 = vmov 0.0   ;;  %v520_v10 = vld [vmem:[%s906_s2] sm:$0xff] }
  0x41   : > { %768 = vmatprep.subr.bf16.mxu0 %v811_v8  ;;  %765 = vmatprep.mubr.msk.f32.mxu0 %vm812_vm0, %v813_v9  ;;  %v521_v11 = vld [vmem:[%s906_s2 + $0x8] sm:$0xff]  ;;  %v522_v12 = vld [vmem:[%s906_s2 + $0x10] sm:$0xff]  ;;  %v523_v14 = vld [vmem:[%s906_s2 + $0x18] sm:$0xff]  ;;  %vm524_vm1 = vcmask 261120   ;;  %vm598_vm2 = vcmask 31744  }
  0x42   : > { %v769_v13 = vpack.c.bf16 %v521_v11, %v520_v10  ;;  %v772_v15 = vpack.c.bf16 %v523_v14, %v522_v12 }
  0x44   : > { %770 = vmatpush3.bf16.msra.mxu0 %v769_v13  ;;  %v519_v16 = vld [vmem:[#allocation2] sm:$0xff] }
  0x45   : > { %771 = vmatprep.subr.bf16.mxu0 %v811_v8 }
  0x48   : > { %773 = vmatpush3.bf16.msra.mxu0 %v772_v15 }
  0x4b   : > { %766 = vmatmul.mubr.msk.f32.vlgmr.msra.gmra.mrb[0].mxu0 %vm524_vm1, %v519_v16 }
 0x11e   : > { %v594_v17 = vpop.f32.mrb[0].mxu0 }
 0x11f   : > { %599 = vst.msk [vmem:[%s853_s24] sm:$0xff] %vm598_vm2, %v594_v17  ;;  %v767_v18 = vpop.f32.mrb[1].mxu0 }
 0x120 PF: > { %s19_s17 = sadd.s32 1, %s808_s17  }
 0x121   : > { %p16_p3 = scmp.ge.s32.totalorder %s19_s17, 4  }
 0x123   :  { %18 = sbr.rel (!%p16_p3) target bundleno = 16 (0x10), region = 386 }
 0x12a   :  { %619 = vsyncmov [#allocation3] }
 0x12d   :  { %s620_s18 = vpop.sfrf %619 }
 0x12e   :  { %p751_p4 = scmp.ne.s32.totalorder %s620_s18, 0 }
 0x130   :  { %624 = shalt.err (%p751_p4)  }

</bundles_post_ra>
